<compile_context>
chip_gen: v5e
topology: v5e:2x2
jax: 0.10.0
libtpu: 0.0.40
codegen_flags: <defaults>
</compile_context>

<pallas_src>
import math

import jax
import jax.numpy as jnp
from jax.experimental import pallas as pl
from jax.experimental.pallas import tpu as pltpu

LANE = 128     # TPU lane width
SUBLANE = 8    # TPU sublane width


def _round_up(n, m):
    return ((n + m - 1) // m) * m


def _critic_kernel(s_ref, a_ref, w1s_ref, w1a_ref, b1_ref,
                   w2_ref, b2_ref, w3_ref, b3_ref, out_ref):
    """Fused 3-layer MLP forward: relu -> relu -> linear (Q-value head).

    fc1 over the split (state, action) inputs is mathematically identical to
    fc1 over their concatenation:  cat(s,a) @ W1 == s @ W1[:S] + a @ W1[S:].
    """
    # fc1 + ReLU
    h1 = (jnp.dot(s_ref[...], w1s_ref[...], preferred_element_type=jnp.float32)
          + jnp.dot(a_ref[...], w1a_ref[...], preferred_element_type=jnp.float32)
          + b1_ref[...])
    h1 = jnp.maximum(h1, 0.0)                                         # (tb, H1)

    # fc2 + ReLU
    h2 = jnp.dot(h1, w2_ref[...], preferred_element_type=jnp.float32) + b2_ref[...]
    h2 = jnp.maximum(h2, 0.0)                                         # (tb, H2)

    # fc3 (linear output, no activation -- Q-value)
    h3 = jnp.dot(h2, w3_ref[...], preferred_element_type=jnp.float32) + b3_ref[...]  # (tb, Np)

    # Pack the Q-values: transpose on the XLU (idle slot here) and keep only the
    # real output rows -> lane-major (output_size, tb) tile. This makes the HBM
    # writeback ~128x smaller than a padded (tb, 128) slab.
    n_out = out_ref.shape[0]
    out_ref[...] = jnp.transpose(h3)[:n_out, :].astype(out_ref.dtype)


def init_critic_params(key, input_size, output_size, fc1_units=40, fc2_units=20):
    """Parameter init mirroring the PyTorch Critic.reset_parameters().

    fc1/fc2 weights ~ U(-1/sqrt(fan), 1/sqrt(fan)) with fan = weight.size(0)
    (= out_features, matching the module's hidden_init quirk), fc3 ~ U(-3e-3, 3e-3).
    Biases keep the nn.Linear default U(-1/sqrt(in_features), 1/sqrt(in_features)).
    Weights are stored as (in_features, out_features) so the kernel does y = x @ W + b.
    """
    k = jax.random.split(key, 6)

    lim1 = 1.0 / math.sqrt(fc1_units)   # hidden_init uses weight.size(0) == out_features
    lim2 = 1.0 / math.sqrt(fc2_units)
    lim3 = 0.003

    b1_lim = 1.0 / math.sqrt(input_size)
    b2_lim = 1.0 / math.sqrt(fc1_units)
    b3_lim = 1.0 / math.sqrt(fc2_units)

    return {
        "w1": jax.random.uniform(k[0], (input_size, fc1_units), jnp.float32, -lim1, lim1),
        "b1": jax.random.uniform(k[1], (1, fc1_units), jnp.float32, -b1_lim, b1_lim),
        "w2": jax.random.uniform(k[2], (fc1_units, fc2_units), jnp.float32, -lim2, lim2),
        "b2": jax.random.uniform(k[3], (1, fc2_units), jnp.float32, -b2_lim, b2_lim),
        "w3": jax.random.uniform(k[4], (fc2_units, output_size), jnp.float32, -lim3, lim3),
        "b3": jax.random.uniform(k[5], (1, output_size), jnp.float32, -b3_lim, b3_lim),
    }


def pad_critic_params(params, state_size, lane=LANE):
    """Split fc1's weight into state/action halves and zero-pad the hidden and
    output feature dims to the lane width (done once, outside the hot path).

    The state/action feature dims themselves are NOT padded: they are tiny, the
    MXU pads the contraction internally, and padding them would only inflate
    per-step activation DMA traffic.

    Invariant: all padding is zeros, so padded hidden columns stay exactly 0
    through bias-add + ReLU and contribute nothing downstream.
    """
    def pad_cols(a, cols):
        return jnp.pad(a, ((0, 0), (0, cols - a.shape[1])))

    def pad2d(a, rows, cols):
        return jnp.pad(a, ((0, rows - a.shape[0]), (0, cols - a.shape[1])))

    w1, b1 = params["w1"], params["b1"]
    w2, b2 = params["w2"], params["b2"]
    w3, b3 = params["w3"], params["b3"]

    _, h1 = w1.shape
    _, h2 = w2.shape
    _, n_out = w3.shape

    h1_p = _round_up(h1, lane)
    h2_p = _round_up(h2, lane)
    n_p = _round_up(n_out, lane)

    return {
        "w1s": pad_cols(w1[:state_size], h1_p),   # (S,  H1p)
        "w1a": pad_cols(w1[state_size:], h1_p),   # (A,  H1p)
        "b1":  pad_cols(b1, h1_p),                # (1,  H1p)
        "w2":  pad2d(w2, h1_p, h2_p),             # (H1p, H2p)
        "b2":  pad_cols(b2, h2_p),                # (1,  H2p)
        "w3":  pad2d(w3, h2_p, n_p),              # (H2p, Np)
        "b3":  pad_cols(b3, n_p),                 # (1,  Np)
    }


def critic_forward(state, action, padded_params, output_size, *, batch_tile=1024):
    """Run the fused Critic forward pass as one pallas_call.

    Args:
      state:  (B, state_size)  float32.
      action: (B, action_size) float32.
      padded_params: dict from pad_critic_params.
      output_size: real (unpadded) Q-value dimension (normally 1).
      batch_tile: max rows per grid step for large batches (rounded to 128).

    Returns:
      (B, output_size) float32 Q-values.
    """
    state = state.astype(jnp.float32)
    action = action.astype(jnp.float32)
    B, S = state.shape
    _, A = action.shape

    w1s, w1a = padded_params["w1s"], padded_params["w1a"]
    b1, w2, b2 = padded_params["b1"], padded_params["w2"], padded_params["b2"]
    w3, b3 = padded_params["w3"], padded_params["b3"]
    H1 = w1s.shape[1]
    H2 = w2.shape[1]
    Np = w3.shape[1]

    # Batch tiling:
    #  * small/moderate batch -> one big block (grid=(1,)): the grid is a serial
    #    loop with ~600-cycle per-step overhead on 1-TC chips (v5e/v6e).
    #  * large batch -> lane-aligned tiles of `batch_tile` rows; >=2 "parallel"
    #    steps so v7x's two TensorCores can each take a share, and each tile's
    #    double-buffered VMEM footprint stays ~1-2 MiB (fits v5e's 16 MiB limit).
    B8 = _round_up(B, SUBLANE)
    tb_cap = max(LANE, _round_up(batch_tile, LANE))
    tb = B8 if B8 <= tb_cap else tb_cap
    B_pad = _round_up(B, tb)

    if B_pad != B:
        state = jnp.pad(state, ((0, B_pad - B), (0, 0)))
        action = jnp.pad(action, ((0, B_pad - B), (0, 0)))

    grid = (B_pad // tb,)

    in_specs = [
        pl.BlockSpec((tb, S), lambda i: (i, 0)),     # state rows (real width, no feature pad)
        pl.BlockSpec((tb, A), lambda i: (i, 0)),     # action rows
        pl.BlockSpec((S, H1), lambda i: (0, 0)),     # weights/biases: constant index_map
        pl.BlockSpec((A, H1), lambda i: (0, 0)),     #   -> stay VMEM-resident across steps
        pl.BlockSpec((1, H1), lambda i: (0, 0)),
        pl.BlockSpec((H1, H2), lambda i: (0, 0)),
        pl.BlockSpec((1, H2), lambda i: (0, 0)),
        pl.BlockSpec((H2, Np), lambda i: (0, 0)),
        pl.BlockSpec((1, Np), lambda i: (0, 0)),
    ]
    # Packed, lane-major output: (output_size, B_pad) instead of a (B_pad, 128) slab.
    out_spec = pl.BlockSpec((output_size, tb), lambda i: (0, i))

    operands = (state, action, w1s, w1a, b1, w2, b2, w3, b3)

    bytes_accessed = sum(int(op.size) * op.dtype.itemsize for op in operands)
    bytes_accessed += output_size * B_pad * 4
    flops = 2 * B_pad * (S * H1 + A * H1 + H1 * H2 + H2 * Np)

    out_packed = pl.pallas_call(
        _critic_kernel,
        out_shape=jax.ShapeDtypeStruct((output_size, B_pad), jnp.float32),
        grid=grid,
        in_specs=in_specs,
        out_specs=out_spec,
        compiler_params=pltpu.CompilerParams(
            dimension_semantics=("parallel",)),       # shards batch steps across TCs on v7x
        cost_estimate=pl.CostEstimate(
            flops=flops, transcendentals=0, bytes_accessed=bytes_accessed),
    )(*operands)

    # (output_size, B_pad) -> (B, output_size)
    return out_packed[:, :B].T


def _reference_forward(state, action, params):
    """Plain-JAX reference (unpadded, concatenated params) for correctness checking."""
    x = jnp.concatenate([state, action], axis=1)
    h1 = jnp.maximum(x @ params["w1"] + params["b1"], 0.0)
    h2 = jnp.maximum(h1 @ params["w2"] + params["b2"], 0.0)
    return h2 @ params["w3"] + params["b3"]


if __name__ == "__main__":
    key = jax.random.PRNGKey(0)
    k_params, k_state, k_action = jax.random.split(key, 3)

    batch = 8
    state_size = 32
    action_size = 8
    input_size = state_size + action_size   # Critic input = state_size + action_size
    output_size = 1                          # Q-value
    fc1_units, fc2_units = 40, 20

    params = init_critic_params(k_params, input_size, output_size, fc1_units, fc2_units)
    padded_params = pad_critic_params(params, state_size)

    state = jax.random.normal(k_state, (batch, state_size), jnp.float32)
    action = jax.random.normal(k_action, (batch, action_size), jnp.float32)

    q = critic_forward(state, action, padded_params, output_size)
    q = jax.block_until_ready(q)

    ref = _reference_forward(state, action, params)
    assert q.shape == (batch, output_size)
    assert jnp.allclose(q, ref, atol=1e-4, rtol=1e-4), "mismatch vs reference"

    print("KERNEL_OK")
</pallas_src>

<mosaic_0001>
module attributes {stable_mosaic.version = 11 : i64} {
  func.func @_critic_kernel(%arg0: i32, %arg1: memref<8x32xf32, #tpu.memory_space<vmem>>, %arg2: memref<8x8xf32, #tpu.memory_space<vmem>>, %arg3: memref<32x128xf32, #tpu.memory_space<vmem>>, %arg4: memref<8x128xf32, #tpu.memory_space<vmem>>, %arg5: memref<1x128xf32, #tpu.memory_space<vmem>>, %arg6: memref<128x128xf32, #tpu.memory_space<vmem>>, %arg7: memref<1x128xf32, #tpu.memory_space<vmem>>, %arg8: memref<128x128xf32, #tpu.memory_space<vmem>>, %arg9: memref<1x128xf32, #tpu.memory_space<vmem>>, %arg10: memref<1x8xf32, #tpu.memory_space<vmem>>) attributes {dimension_semantics = [#tpu.dimension_semantics<parallel>], iteration_bounds = array<i64: 1>, scalar_prefetch = 0 : i64, scratch_operands = 0 : i64, tpu.core_type = #tpu.core_type<tc>, window_params = [{transform_indices = @transform_0, window_bounds = array<i64: 8, 32>}, {transform_indices = @transform_1, window_bounds = array<i64: 8, 8>}, {pipeline_mode = #tpu.pipeline_mode<synchronous>, transform_indices = @transform_2, window_bounds = array<i64: 32, 128>}, {pipeline_mode = #tpu.pipeline_mode<synchronous>, transform_indices = @transform_3, window_bounds = array<i64: 8, 128>}, {pipeline_mode = #tpu.pipeline_mode<synchronous>, transform_indices = @transform_4, window_bounds = array<i64: 1, 128>}, {pipeline_mode = #tpu.pipeline_mode<synchronous>, transform_indices = @transform_5, window_bounds = array<i64: 128, 128>}, {pipeline_mode = #tpu.pipeline_mode<synchronous>, transform_indices = @transform_6, window_bounds = array<i64: 1, 128>}, {pipeline_mode = #tpu.pipeline_mode<synchronous>, transform_indices = @transform_7, window_bounds = array<i64: 128, 128>}, {pipeline_mode = #tpu.pipeline_mode<synchronous>, transform_indices = @transform_8, window_bounds = array<i64: 1, 128>}, {transform_indices = @transform_9, window_bounds = array<i64: 1, 8>}]} {
    %c0 = arith.constant 0 : index
    %c0_0 = arith.constant 0 : index
    %0 = vector.load %arg1[%c0, %c0_0] : memref<8x32xf32, #tpu.memory_space<vmem>>, vector<8x32xf32>
    %c0_1 = arith.constant 0 : index
    %c0_2 = arith.constant 0 : index
    %1 = vector.load %arg3[%c0_1, %c0_2] : memref<32x128xf32, #tpu.memory_space<vmem>>, vector<32x128xf32>
    %cst = arith.constant dense<0.000000e+00> : vector<8x128xf32>
    %2 = tpu.matmul %0, %1, %cst {dimension_numbers = #tpu.dot_dimension_numbers<[1], [0], [0], [1], [0, 0, 1, 1], [], []>} : vector<8x32xf32>, vector<32x128xf32>, vector<8x128xf32> -> vector<8x128xf32>
    %c0_3 = arith.constant 0 : index
    %c0_4 = arith.constant 0 : index
    %3 = vector.load %arg2[%c0_3, %c0_4] : memref<8x8xf32, #tpu.memory_space<vmem>>, vector<8x8xf32>
    %c0_5 = arith.constant 0 : index
    %c0_6 = arith.constant 0 : index
    %4 = vector.load %arg4[%c0_5, %c0_6] : memref<8x128xf32, #tpu.memory_space<vmem>>, vector<8x128xf32>
    %cst_7 = arith.constant dense<0.000000e+00> : vector<8x128xf32>
    %5 = tpu.matmul %3, %4, %cst_7 {dimension_numbers = #tpu.dot_dimension_numbers<[1], [0], [0], [1], [0, 0, 1, 1], [], []>} : vector<8x8xf32>, vector<8x128xf32>, vector<8x128xf32> -> vector<8x128xf32>
    %6 = arith.addf %2, %5 : vector<8x128xf32>
    %c0_8 = arith.constant 0 : index
    %c0_9 = arith.constant 0 : index
    %7 = vector.load %arg5[%c0_8, %c0_9] : memref<1x128xf32, #tpu.memory_space<vmem>>, vector<1x128xf32>
    %8 = vector.broadcast %7 : vector<1x128xf32> to vector<8x128xf32>
    %9 = arith.addf %6, %8 : vector<8x128xf32>
    %cst_10 = arith.constant 0.000000e+00 : f32
    %10 = vector.broadcast %cst_10 : f32 to vector<8x128xf32>
    %11 = arith.maximumf %9, %10 : vector<8x128xf32>
    %c0_11 = arith.constant 0 : index
    %c0_12 = arith.constant 0 : index
    %12 = vector.load %arg6[%c0_11, %c0_12] : memref<128x128xf32, #tpu.memory_space<vmem>>, vector<128x128xf32>
    %cst_13 = arith.constant dense<0.000000e+00> : vector<8x128xf32>
    %13 = tpu.matmul %11, %12, %cst_13 {dimension_numbers = #tpu.dot_dimension_numbers<[1], [0], [0], [1], [0, 0, 1, 1], [], []>} : vector<8x128xf32>, vector<128x128xf32>, vector<8x128xf32> -> vector<8x128xf32>
    %c0_14 = arith.constant 0 : index
    %c0_15 = arith.constant 0 : index
    %14 = vector.load %arg7[%c0_14, %c0_15] : memref<1x128xf32, #tpu.memory_space<vmem>>, vector<1x128xf32>
    %15 = vector.broadcast %14 : vector<1x128xf32> to vector<8x128xf32>
    %16 = arith.addf %13, %15 : vector<8x128xf32>
    %cst_16 = arith.constant 0.000000e+00 : f32
    %17 = vector.broadcast %cst_16 : f32 to vector<8x128xf32>
    %18 = arith.maximumf %16, %17 : vector<8x128xf32>
    %c0_17 = arith.constant 0 : index
    %c0_18 = arith.constant 0 : index
    %19 = vector.load %arg8[%c0_17, %c0_18] : memref<128x128xf32, #tpu.memory_space<vmem>>, vector<128x128xf32>
    %cst_19 = arith.constant dense<0.000000e+00> : vector<8x128xf32>
    %20 = tpu.matmul %18, %19, %cst_19 {dimension_numbers = #tpu.dot_dimension_numbers<[1], [0], [0], [1], [0, 0, 1, 1], [], []>} : vector<8x128xf32>, vector<128x128xf32>, vector<8x128xf32> -> vector<8x128xf32>
    %c0_20 = arith.constant 0 : index
    %c0_21 = arith.constant 0 : index
    %21 = vector.load %arg9[%c0_20, %c0_21] : memref<1x128xf32, #tpu.memory_space<vmem>>, vector<1x128xf32>
    %22 = vector.broadcast %21 : vector<1x128xf32> to vector<8x128xf32>
    %23 = arith.addf %20, %22 : vector<8x128xf32>
    %24 = tpu.transpose %23, [1, 0] : vector<8x128xf32> -> vector<128x8xf32>
    %25 = vector.extract_strided_slice %24 {offsets = [0, 0], sizes = [1, 8], strides = [1, 1]} : vector<128x8xf32> to vector<1x8xf32>
    %c0_22 = arith.constant 0 : index
    %c0_23 = arith.constant 0 : index
    %26 = vector.load %arg10[%c0_22, %c0_23] : memref<1x8xf32, #tpu.memory_space<vmem>>, vector<1x8xf32>
    tpu.vector_store %arg10[%c0_22, %c0_23], %25 {strides = array<i32>} : memref<1x8xf32, #tpu.memory_space<vmem>>, vector<1x8xf32>,
    return
  }
  func.func @transform_0(%arg0: i32) -> (i32, i32) {
    %c0_i32 = arith.constant 0 : i32
    %c0_i32_0 = arith.constant 0 : i32
    return %arg0, %c0_i32 : i32, i32
  }
  func.func @transform_1(%arg0: i32) -> (i32, i32) {
    %c0_i32 = arith.constant 0 : i32
    %c0_i32_0 = arith.constant 0 : i32
    return %arg0, %c0_i32 : i32, i32
  }
  func.func @transform_2(%arg0: i32) -> (i32, i32) {
    %c0_i32 = arith.constant 0 : i32
    %c0_i32_0 = arith.constant 0 : i32
    %c0_i32_1 = arith.constant 0 : i32
    return %c0_i32, %c0_i32_0 : i32, i32
  }
  func.func @transform_3(%arg0: i32) -> (i32, i32) {
    %c0_i32 = arith.constant 0 : i32
    %c0_i32_0 = arith.constant 0 : i32
    %c0_i32_1 = arith.constant 0 : i32
    return %c0_i32, %c0_i32_0 : i32, i32
  }
  func.func @transform_4(%arg0: i32) -> (i32, i32) {
    %c0_i32 = arith.constant 0 : i32
    %c0_i32_0 = arith.constant 0 : i32
    %c0_i32_1 = arith.constant 0 : i32
    return %c0_i32, %c0_i32_0 : i32, i32
  }
  func.func @transform_5(%arg0: i32) -> (i32, i32) {
    %c0_i32 = arith.constant 0 : i32
    %c0_i32_0 = arith.constant 0 : i32
    %c0_i32_1 = arith.constant 0 : i32
    return %c0_i32, %c0_i32_0 : i32, i32
  }
  func.func @transform_6(%arg0: i32) -> (i32, i32) {
    %c0_i32 = arith.constant 0 : i32
    %c0_i32_0 = arith.constant 0 : i32
    %c0_i32_1 = arith.constant 0 : i32
    return %c0_i32, %c0_i32_0 : i32, i32
  }
  func.func @transform_7(%arg0: i32) -> (i32, i32) {
    %c0_i32 = arith.constant 0 : i32
    %c0_i32_0 = arith.constant 0 : i32
    %c0_i32_1 = arith.constant 0 : i32
    return %c0_i32, %c0_i32_0 : i32, i32
  }
  func.func @transform_8(%arg0: i32) -> (i32, i32) {
    %c0_i32 = arith.constant 0 : i32
    %c0_i32_0 = arith.constant 0 : i32
    %c0_i32_1 = arith.constant 0 : i32
    return %c0_i32, %c0_i32_0 : i32, i32
  }
  func.func @transform_9(%arg0: i32) -> (i32, i32) {
    %c0_i32 = arith.constant 0 : i32
    %c0_i32_0 = arith.constant 0 : i32
    return %c0_i32, %arg0 : i32, i32
  }
}

</mosaic_0001>

<bundles_post_ra>
// kernel: tpu_custom_call.1
= control target key start
LH: loop header
LB: loop body
LE: loop exit
PB: predicated region body
PF: predicated region fallthrough
CT: control target
= control target key end

     0   :  { %14 = vsyncpa [#allocation3], 0  ;;  %s599_s0 = inlined_call_operand.hbm [shape: f32[8,32], index: 0, kind: input, shape index: {}]   ;;  %s600_s1 = inlined_call_operand.hbm [shape: f32[8,8], index: 1, kind: input, shape index: {}]   ;;  %s601_s2 = inlined_call_operand.hbm [shape: f32[32,128], index: 2, kind: input, shape index: {}]   ;;  %s602_s3 = inlined_call_operand.hbm [shape: f32[8,128], index: 3, kind: input, shape index: {}]   ;;  %s603_s4 = inlined_call_operand.vmem [shape: f32[1,128], index: 4, kind: input, shape index: {}]   ;;  %s604_s5 = inlined_call_operand.hbm [shape: f32[128,128], index: 5, kind: input, shape index: {}]   ;;  %s605_s6 = inlined_call_operand.vmem [shape: f32[1,128], index: 6, kind: input, shape index: {}]   ;;  %s606_s7 = inlined_call_operand.hbm [shape: f32[128,128], index: 7, kind: input, shape index: {}]   ;;  %s607_s8 = inlined_call_operand.vmem [shape: f32[1,128], index: 8, kind: input, shape index: {}]   ;;  %s608_s9 = inlined_call_operand.hbm [shape: f32[1,8], index: 9, kind: output, shape index: {}]  }
   0x1   :  { %15 = vsyncpa [#allocation6], 0 }
   0x2   :  { %16 = vsyncpa [#allocation9], 0 }
   0x3   :  { %17 = vsyncpa [#allocation12], 0  ;;  %s35_s11 = sshll.u32 %s600_s1, 4  ;;  %s36_s11 = int_to_ptr.hbm [resolvable:$true] %s35_s11 }
   0x4   :  { %18 = vsyncpa [#allocation4], 0  ;;  %s510_s12 = smov [#allocation5]   ;;  %s59_s16 = sshll.u32 %s602_s3, 4  ;;  %s60_s16 = int_to_ptr.hbm [resolvable:$true] %s59_s16 }
   0x5   :  { %s37_s13 = sshll.u32 %s510_s12, 4  ;;  %s511_s17 = smov [#allocation8]   ;;  %s38_s13 = int_to_ptr.vmem [resolvable:$true] %s37_s13 }
   0x6   :  { %40 = dma.hbm_to_vmem [thread:$0]  %s36_s11, 128, %s38_s13, [#allocation6]  }
   0x7   :  { %s61_s18 = sshll.u32 %s511_s17, 4  ;;  %s24_s21 = sshll.u32 %s599_s0, 4  ;;  %s62_s18 = int_to_ptr.vmem [resolvable:$true] %s61_s18  ;;  %s25_s21 = int_to_ptr.hbm [resolvable:$true] %s24_s21 }
   0x8   :  { %64 = dma.hbm_to_vmem [thread:$0]  %s60_s16, 128, %s62_s18, [#allocation9]  }
   0x9   :  { %s45_s23 = sshll.u32 %s601_s2, 4  ;;  %s512_s24 = smov [#allocation2]   ;;  %s46_s23 = int_to_ptr.hbm [resolvable:$true] %s45_s23 }
   0xa   :  { %s26_s25 = sshll.u32 %s512_s24, 4  ;;  %s513_s3 = smov [#allocation7]   ;;  %s27_s25 = int_to_ptr.vmem [resolvable:$true] %s26_s25 }
   0xb   :  { %29 = dma.hbm_to_vmem [thread:$0]  %s25_s21, 128, %s27_s25, [#allocation3]  }
   0xc   :  { %s47_s26 = sshll.u32 %s513_s3, 4  ;;  %s514_s27 = smov 128   ;;  %s48_s26 = int_to_ptr.vmem [resolvable:$true] %s47_s26 }
   0xd   :  { %s515_s28 = smov 8   ;;  %s71_s30 = sshll.u32 %s604_s5, 4  ;;  %s72_s30 = int_to_ptr.hbm [resolvable:$true] %s71_s30 }
   0xe   :  { %53 = dma.hbm_to_vmem [thread:$0]  %s46_s23, 512, %s48_s26, [#allocation6], %s514_s27, %s514_s27, %s515_s28  }
   0xf   :  { %s516_s10 = smov [#allocation10]   ;;  %s86_s13 = sshll.u32 %s606_s7, 4  ;;  %s87_s13 = int_to_ptr.hbm [resolvable:$true] %s86_s13 }
  0x10   :  { %s73_s11 = sshll.u32 %s516_s10, 4  ;;  %s517_s14 = smov [#allocation11]   ;;  %s74_s11 = int_to_ptr.vmem [resolvable:$true] %s73_s11 }
  0x11   :  { %79 = dma.hbm_to_vmem [thread:$0]  %s72_s30, 2048, %s74_s11, [#allocation9], %s514_s27, %s514_s27, %s515_s28  }
  0x12   :  { %s88_s15 = sshll.u32 %s517_s14, 4  ;;  %s89_s15 = int_to_ptr.vmem [resolvable:$true] %s88_s15 }
  0x13   :  { %94 = dma.hbm_to_vmem [thread:$0]  %s87_s13, 2048, %s89_s15, [#allocation12], %s514_s27, %s514_s27, %s515_s28  }
  0x14   :  { %500 = dma.done.wait [#allocation3], 128  }
  0x15   :  { %501 = vsyncadd [#allocation3], 4294967168 }
  0x16   :  { %502 = dma.done.wait [#allocation6], 640  }
  0x17   :  { %503 = vsyncadd [#allocation6], 4294966656 }
  0x18   :  { %504 = dma.done.wait [#allocation9], 2176  }
  0x19   :  { %505 = vsyncadd [#allocation9], 4294965120 }
  0x1a   :  { %506 = dma.done.wait [#allocation12], 2048  }
  0x1b   :  { %507 = vsyncadd [#allocation12], 4294965248  ;;  %v125_v0 = vld [vmem:[#allocation7 + $0x18] sm:$0xff]  ;;  %v124_v1 = vld [vmem:[#allocation7 + $0x10] sm:$0xff]  ;;  %vm128_vm0 = vcmask 64512   ;;  %vm152_vm1 = vcmask 261120  }
  0x1c   :  { %168 = vmatpush.msra.mxu1 %v125_v0  ;;  %v127_v2 = vld [vmem:[#allocation8] sm:$0xff]  ;;  %v126_v3 = vld [vmem:[#allocation5] sm:$0xff]  ;;  %v123_v4 = vld [vmem:[#allocation7 + $0x8] sm:$0xff]  ;;  %s518_s19 = smov [#allocation13]   ;;  %s304_s22 = sshll.u32 %s608_s9, 4  ;;  %vm295_vm2 = vcmask 57344   ;;  %s305_s22 = int_to_ptr.hbm [resolvable:$true] %s304_s22 }
  0x1d   :  { %147 = vmatpush.msra.mxu0 %v127_v2  ;;  %v197_v5 = vld [vmem:[#allocation10 + $0x78] sm:$0xff]  ;;  %v196_v6 = vld [vmem:[#allocation10 + $0x70] sm:$0xff]  ;;  %v121_v8 = vld [vmem:[#allocation2] sm:$0xff]  ;;  %s302_s20 = sshll.u32 %s518_s19, 4  ;;  %s303_s20 = int_to_ptr.vmem [resolvable:$true] %s302_s20 }
  0x1e   :  { %169 = vmatpush.msra.mxu1 %v124_v1  ;;  %317 = vmatmul.msk.f32.vlgmr.msra.gmra.mxu0 %vm128_vm0, %v126_v3  ;;  %v122_v7 = vld [vmem:[#allocation7] sm:$0xff]  ;;  %v195_v9 = vld [vmem:[#allocation10 + $0x68] sm:$0xff]  ;;  %v194_v10 = vld [vmem:[#allocation10 + $0x60] sm:$0xff] }
  0x1f   :  { %202 = vmatpush.msra.mxu2 %v197_v5  ;;  %v193_v11 = vld [vmem:[#allocation10 + $0x58] sm:$0xff]  ;;  %v192_v12 = vld [vmem:[#allocation10 + $0x50] sm:$0xff]  ;;  %v191_v13 = vld [vmem:[#allocation10 + $0x48] sm:$0xff] }
  0x20   :  { %170 = vmatpush.msra.mxu1 %v123_v4  ;;  %v190_v14 = vld [vmem:[#allocation10 + $0x40] sm:$0xff]  ;;  %v189_v15 = vld [vmem:[#allocation10 + $0x38] sm:$0xff]  ;;  %v188_v16 = vld [vmem:[#allocation10 + $0x30] sm:$0xff] }
  0x21   :  { %203 = vmatpush.msra.mxu2 %v196_v6  ;;  %v187_v17 = vld [vmem:[#allocation10 + $0x28] sm:$0xff]  ;;  %v186_v18 = vld [vmem:[#allocation10 + $0x20] sm:$0xff]  ;;  %v185_v19 = vld [vmem:[#allocation10 + $0x18] sm:$0xff] }
  0x22   :  { %171 = vmatpush.msra.mxu1 %v122_v7  ;;  %v184_v20 = vld [vmem:[#allocation10 + $0x10] sm:$0xff]  ;;  %v183_v21 = vld [vmem:[#allocation10 + $0x8] sm:$0xff]  ;;  %v182_v22 = vld [vmem:[#allocation10] sm:$0xff] }
  0x23   :  { %318 = vmatmul.msk.f32.vlgmr.msra.gmra.mxu1 %vm152_vm1, %v121_v8  ;;  %204 = vmatpush.msra.mxu2 %v195_v9  ;;  %v238_v23 = vld [vmem:[#allocation11 + $0x78] sm:$0xff]  ;;  %v237_v24 = vld [vmem:[#allocation11 + $0x70] sm:$0xff]  ;;  %v236_v25 = vld [vmem:[#allocation11 + $0x68] sm:$0xff] }
  0x24   :  { %243 = vmatpush.msra.mxu3 %v238_v23  ;;  %v235_v26 = vld [vmem:[#allocation11 + $0x60] sm:$0xff]  ;;  %v234_v27 = vld [vmem:[#allocation11 + $0x58] sm:$0xff]  ;;  %v233_v28 = vld [vmem:[#allocation11 + $0x50] sm:$0xff] }
  0x25   :  { %205 = vmatpush.msra.mxu2 %v194_v10  ;;  %v232_v29 = vld [vmem:[#allocation11 + $0x48] sm:$0xff]  ;;  %v231_v30 = vld [vmem:[#allocation11 + $0x40] sm:$0xff]  ;;  %v230_v31 = vld [vmem:[#allocation11 + $0x38] sm:$0xff] }
  0x26   :  { %244 = vmatpush.msra.mxu3 %v237_v24  ;;  %v229_v32 = vld [vmem:[#allocation11 + $0x30] sm:$0xff]  ;;  %v228_v33 = vld [vmem:[#allocation11 + $0x28] sm:$0xff]  ;;  %v227_v34 = vld [vmem:[#allocation11 + $0x20] sm:$0xff] }
  0x27   :  { %206 = vmatpush.msra.mxu2 %v193_v11  ;;  %v226_v35 = vld [vmem:[#allocation11 + $0x18] sm:$0xff]  ;;  %v329_v37 = vld [vmem:[%s603_s4] ss:$0 sm:$0xff]  ;;  %v225_v42 = vld [vmem:[#allocation11 + $0x10] sm:$0xff] }
  0x28   :  { %245 = vmatpush.msra.mxu3 %v236_v25  ;;  %v224_v43 = vld [vmem:[#allocation11 + $0x8] sm:$0xff]  ;;  %v223_v44 = vld [vmem:[#allocation11] sm:$0xff] }
  0x29   :  { %207 = vmatpush.msra.mxu2 %v192_v12  ;;  %v330_v45 = vld [vmem:[%s605_s6] ss:$0 sm:$0xff] }
  0x2a   :  { %246 = vmatpush.msra.mxu3 %v235_v26  ;;  %v331_v49 = vld [vmem:[%s607_s8] ss:$0 sm:$0xff] }
  0x2b   :  { %208 = vmatpush.msra.mxu2 %v191_v13 }
  0x2c   :  { %247 = vmatpush.msra.mxu3 %v234_v27 }
  0x2d   :  { %209 = vmatpush.msra.mxu2 %v190_v14 }
  0x2e   :  { %248 = vmatpush.msra.mxu3 %v233_v28 }
  0x2f   :  { %210 = vmatpush.msra.mxu2 %v189_v15 }
  0x30   :  { %249 = vmatpush.msra.mxu3 %v232_v29 }
  0x31   :  { %211 = vmatpush.msra.mxu2 %v188_v16 }
  0x32   :  { %250 = vmatpush.msra.mxu3 %v231_v30 }
  0x33   :  { %212 = vmatpush.msra.mxu2 %v187_v17 }
  0x34   :  { %251 = vmatpush.msra.mxu3 %v230_v31 }
  0x35   :  { %213 = vmatpush.msra.mxu2 %v186_v18 }
  0x36   :  { %252 = vmatpush.msra.mxu3 %v229_v32 }
  0x37   :  { %214 = vmatpush.msra.mxu2 %v185_v19 }
  0x38   :  { %253 = vmatpush.msra.mxu3 %v228_v33 }
  0x39   :  { %215 = vmatpush.msra.mxu2 %v184_v20 }
  0x3a   :  { %254 = vmatpush.msra.mxu3 %v227_v34 }
  0x3b   :  { %216 = vmatpush.msra.mxu2 %v183_v21 }
  0x3c   :  { %255 = vmatpush.msra.mxu3 %v226_v35 }
  0x3d   :  { %217 = vmatpush.msra.mxu2 %v182_v22 }
  0x3e   :  { %256 = vmatpush.msra.mxu3 %v225_v42 }
  0x40   :  { %257 = vmatpush.msra.mxu3 %v224_v43 }
  0x42   :  { %258 = vmatpush.msra.mxu3 %v223_v44 }
  0x9b   :  { %v149_v36 = vpop.f32.mrf.mxu0 }
  0xa0   :  { %v173_v38 = vpop.f32.mrf.mxu1 }
  0xa1   :  { %v174_v39 = vadd.f32 %v173_v38, %v149_v36 }
  0xa3   :  { %v180_v40 = vadd.f32 %v329_v37, %v174_v39 }
  0xa5   :  { %v181_v41 = vmax.f32 %v180_v40, 0.0 }
  0xa7   :  { %218 = vmatmul.f32.vlgmr.msra.gmra.mxu2 %v181_v41 }
 0x12a   :  { %v219_v46 = vpop.f32.mrf.mxu2 }
 0x12b   :  { %v220_v47 = vadd.f32 %v330_v45, %v219_v46 }
 0x12d   :  { %v222_v48 = vmax.f32 %v220_v47, 0.0 }
 0x12f   :  { %259 = vmatmul.f32.vlgmr.msra.gmra.mxu3 %v222_v48 }
 0x1b2   :  { %v260_v50 = vpop.f32.mrf.mxu3 }
 0x1b3   :  { %v261_v51 = vadd.f32 %v331_v49, %v260_v50 }
 0x1b5   :  { %263 = vxpose.xlu0.b32.start.end [1/1] (short) (narrow) %v261_v51, 8 }
 0x259   :  { %v279_v52 = vpop.trf.xlu0 }
 0x25a   :  { %296 = vst.msk [vmem:[#allocation13] sm:$0x1] %vm295_vm2, %v279_v52 }
 0x25b   :  { %307 = dma.vmem_to_hbm [thread:$0]  %s303_s20, 16, %s305_s22, [#allocation4]  }
 0x25c   :  { %508 = dma.done.wait [#allocation4], 16  }
 0x25d   :  { %509 = vsyncadd [#allocation4], 4294967280 }
 0x25e   :  { %312 = vsyncpa [#allocation3], 1 }
 0x25f   :  { %313 = vsyncpa [#allocation6], 1 }
 0x260   :  { %314 = vsyncpa [#allocation9], 1 }
 0x261   :  { %315 = vsyncpa [#allocation12], 1 }
 0x262   :  { %316 = vsyncpa [#allocation4], 1 }

</bundles_post_ra>
